<compile_context>
chip_gen: v6e
topology: v6e:2x2x1
jax: 0.10.0
libtpu: 0.0.40
codegen_flags: <defaults>
</compile_context>

<pallas_src>
import jax
import jax.numpy as jnp
from jax.experimental import pallas as pl
from jax.experimental.pallas import tpu as pltpu


def fused_pred_head_kernel(*refs):
    """Fused forward of PredHeadBranch for all layers and all batches.

    refs = (x_ref, w0_ref, b0_ref, w1_ref, b1_ref, ..., o_ref)
      x_ref : [B, C0, T]      (PyTorch NCT layout)
      wL_ref: [Cout, 3*CinL]  (im2col-packed Conv1d weight, tap-major rows)
      bL_ref: [Cout, 1]
      o_ref : [B, Cout, T]
    """
    x_ref = refs[0]
    o_ref = refs[-1]
    layer_refs = refs[1:-1]
    n_layers = len(layer_refs) // 2

    B = x_ref.shape[0]
    T = x_ref.shape[2]

    def im2col(per_batch_feats):
        # per_batch_feats: list of B values, each [C, T] (channels x time).
        # Returns [3*C, B*T] where row block k holds tap k (t-1, t, t+1) and
        # the time halo is zero (Conv1d padding=1), per batch segment.
        cols = []
        for h in per_batch_feats:
            c = h.shape[0]
            z = jnp.zeros((c, 1), h.dtype)
            tap_prev = jnp.concatenate([z, h[:, : T - 1]], axis=1)  # x[:, t-1]
            tap_next = jnp.concatenate([h[:, 1:], z], axis=1)       # x[:, t+1]
            cols.append(jnp.concatenate([tap_prev, h, tap_next], axis=0))  # [3C, T]
        return jnp.concatenate(cols, axis=1)                         # [3C, B*T]

    feats = [x_ref[b].astype(jnp.float32) for b in range(B)]  # each [C0, T]

    for layer in range(n_layers):
        w = layer_refs[2 * layer][...]        # [Cout, 3*Cin]
        bias = layer_refs[2 * layer + 1][...]  # [Cout, 1]

        lhs = im2col(feats)                    # [3*Cin, B*T]
        acc = jnp.dot(w, lhs, preferred_element_type=jnp.float32) + bias  # [Cout, B*T]

        # Mish: x * tanh(softplus(x)), in f32 (EUP/VPU).
        h = acc * jnp.tanh(jax.nn.softplus(acc))

        feats = [h[:, b * T:(b + 1) * T] for b in range(B)]  # each [Cout, T]

    for b in range(B):
        o_ref[b] = feats[b].astype(o_ref.dtype)


def pred_head_branch(x_nct, params):
    """Forward pass of PredHeadBranch.

    x_nct : [B, C, T] (PyTorch NCT layout).
    params: list of (weight [Cout, Cin, 3], bias [Cout]) per layer.
    Returns [B, HEAD_DIM, T].
    """
    B, _, T = x_nct.shape
    cout = params[-1][0].shape[0]

    # Pre-pack weights into im2col layout: wmat[co, k*Cin + ci] = w[co, ci, k].
    flat_params = []
    for w, b in params:
        oc, ic, k = w.shape
        wmat = jnp.transpose(w, (0, 2, 1)).reshape(oc, k * ic)  # [Cout, 3*Cin]
        flat_params.append(wmat)
        flat_params.append(b.reshape(oc, 1))

    n_inputs = 1 + len(flat_params)
    return pl.pallas_call(
        fused_pred_head_kernel,
        out_shape=jax.ShapeDtypeStruct((B, cout, T), x_nct.dtype),
        in_specs=[pl.BlockSpec(memory_space=pltpu.MemorySpace.VMEM)] * n_inputs,
        out_specs=pl.BlockSpec(memory_space=pltpu.MemorySpace.VMEM),
    )(x_nct, *flat_params)


def _reference(x_nct, params):
    """Pure-JAX reference (lax conv) for a correctness check."""
    feat = x_nct
    for w, b in params:
        out = jax.lax.conv_general_dilated(
            feat, w, window_strides=(1,), padding=((1, 1),),
            dimension_numbers=("NCH", "OIH", "NCH"))
        out = out + b[None, :, None]
        feat = out * jnp.tanh(jax.nn.softplus(out))
    return feat


if __name__ == "__main__":
    # cfg.MODEL.HEAD_LAYERS = 2, cfg.MODEL.REDU_CHA_DIM = 32, cfg.MODEL.HEAD_DIM = 32
    HEAD_LAYERS = 2
    REDU_CHA_DIM = 32
    HEAD_DIM = 32
    B, T = 2, 16

    key = jax.random.PRNGKey(0)
    key, kx = jax.random.split(key)
    x = jax.random.normal(kx, (B, REDU_CHA_DIM, T), dtype=jnp.float32)

    params = []
    for layer in range(HEAD_LAYERS):
        in_ch = REDU_CHA_DIM if layer == 0 else HEAD_DIM
        out_ch = HEAD_DIM
        key, kw, kb = jax.random.split(key, 3)
        # deterministic synthetic init (roughly kaiming-uniform scale)
        bound = 1.0 / (in_ch * 3) ** 0.5
        w = jax.random.uniform(kw, (out_ch, in_ch, 3), jnp.float32, -bound, bound)
        b = jax.random.uniform(kb, (out_ch,), jnp.float32, -bound, bound)
        params.append((w, b))

    fwd = jax.jit(pred_head_branch)
    out = jax.block_until_ready(fwd(x, params))

    ref = _reference(x, params)
    assert out.shape == (B, HEAD_DIM, T)
    assert jnp.allclose(out, ref, atol=1e-4, rtol=1e-4), "mismatch vs reference"

    print("KERNEL_OK")
</pallas_src>

<mosaic_0001>
module attributes {stable_mosaic.version = 11 : i64} {
  func.func @fused_pred_head_kernel(%arg0: memref<2x32x16xf32, #tpu.memory_space<vmem>>, %arg1: memref<32x96xf32, #tpu.memory_space<vmem>>, %arg2: memref<32x1xf32, #tpu.memory_space<vmem>>, %arg3: memref<32x96xf32, #tpu.memory_space<vmem>>, %arg4: memref<32x1xf32, #tpu.memory_space<vmem>>, %arg5: memref<2x32x16xf32, #tpu.memory_space<vmem>>) attributes {dimension_semantics = [], scalar_prefetch = 0 : i64, scratch_operands = 0 : i64, tpu.core_type = #tpu.core_type<tc>} {
    %c0 = arith.constant 0 : index
    %c0_0 = arith.constant 0 : index
    %c0_1 = arith.constant 0 : index
    %0 = vector.load %arg0[%c0, %c0_0, %c0_1] : memref<2x32x16xf32, #tpu.memory_space<vmem>>, vector<1x32x16xf32>
    %1 = vector.shape_cast %0 : vector<1x32x16xf32> to vector<32x16xf32>
    %c1 = arith.constant 1 : index
    %c0_2 = arith.constant 0 : index
    %c0_3 = arith.constant 0 : index
    %2 = vector.load %arg0[%c1, %c0_2, %c0_3] : memref<2x32x16xf32, #tpu.memory_space<vmem>>, vector<1x32x16xf32>
    %3 = vector.shape_cast %2 : vector<1x32x16xf32> to vector<32x16xf32>
    %c0_4 = arith.constant 0 : index
    %c0_5 = arith.constant 0 : index
    %4 = vector.load %arg1[%c0_4, %c0_5] : memref<32x96xf32, #tpu.memory_space<vmem>>, vector<32x96xf32>
    %c0_6 = arith.constant 0 : index
    %c0_7 = arith.constant 0 : index
    %5 = vector.load %arg2[%c0_6, %c0_7] : memref<32x1xf32, #tpu.memory_space<vmem>>, vector<32x1xf32>
    %cst = arith.constant 0.000000e+00 : f32
    %6 = vector.broadcast %cst : f32 to vector<32x1xf32>
    %7 = vector.extract_strided_slice %1 {offsets = [0, 0], sizes = [32, 15], strides = [1, 1]} : vector<32x16xf32> to vector<32x15xf32>
    %8 = tpu.concatenate %6, %7 in 1 : vector<32x1xf32>, vector<32x15xf32> -> vector<32x16xf32>
    %9 = vector.extract_strided_slice %1 {offsets = [0, 1], sizes = [32, 15], strides = [1, 1]} : vector<32x16xf32> to vector<32x15xf32>
    %10 = tpu.concatenate %9, %6 in 1 : vector<32x15xf32>, vector<32x1xf32> -> vector<32x16xf32>
    %11 = tpu.concatenate %8, %1, %10 in 0 : vector<32x16xf32>, vector<32x16xf32>, vector<32x16xf32> -> vector<96x16xf32>
    %cst_8 = arith.constant 0.000000e+00 : f32
    %12 = vector.broadcast %cst_8 : f32 to vector<32x1xf32>
    %13 = vector.extract_strided_slice %3 {offsets = [0, 0], sizes = [32, 15], strides = [1, 1]} : vector<32x16xf32> to vector<32x15xf32>
    %14 = tpu.concatenate %12, %13 in 1 : vector<32x1xf32>, vector<32x15xf32> -> vector<32x16xf32>
    %15 = vector.extract_strided_slice %3 {offsets = [0, 1], sizes = [32, 15], strides = [1, 1]} : vector<32x16xf32> to vector<32x15xf32>
    %16 = tpu.concatenate %15, %12 in 1 : vector<32x15xf32>, vector<32x1xf32> -> vector<32x16xf32>
    %17 = tpu.concatenate %14, %3, %16 in 0 : vector<32x16xf32>, vector<32x16xf32>, vector<32x16xf32> -> vector<96x16xf32>
    %18 = tpu.concatenate %11, %17 in 1 : vector<96x16xf32>, vector<96x16xf32> -> vector<96x32xf32>
    %cst_9 = arith.constant dense<0.000000e+00> : vector<32x32xf32>
    %19 = tpu.matmul %4, %18, %cst_9 {dimension_numbers = #tpu.dot_dimension_numbers<[1], [0], [0], [1], [0, 0, 1, 1], [], []>} : vector<32x96xf32>, vector<96x32xf32>, vector<32x32xf32> -> vector<32x32xf32>
    %20 = vector.broadcast %5 : vector<32x1xf32> to vector<32x32xf32>
    %21 = arith.addf %19, %20 : vector<32x32xf32>
    %cst_10 = arith.constant 0.000000e+00 : f32
    %22 = vector.broadcast %cst_10 : f32 to vector<32x32xf32>
    %23 = arith.maximumf %21, %22 : vector<32x32xf32>
    %24 = vector.broadcast %cst_10 : f32 to vector<32x32xf32>
    %25 = arith.subf %21, %24 : vector<32x32xf32>
    %26 = arith.cmpf one, %25, %25 : vector<32x32xf32>
    %27 = vector.broadcast %cst_10 : f32 to vector<32x32xf32>
    %28 = arith.addf %21, %27 : vector<32x32xf32>
    %29 = math.absf %25 : vector<32x32xf32>
    %cst_11 = arith.constant 0.000000e+00 : f32
    %30 = vector.broadcast %cst_11 : f32 to vector<32x32xf32>
    %31 = arith.subf %30, %29 : vector<32x32xf32>
    %32 = math.exp %31 : vector<32x32xf32>
    %33 = math.log1p %32 : vector<32x32xf32>
    %34 = arith.addf %23, %33 : vector<32x32xf32>
    %35 = arith.select %26, %28, %34 : vector<32x32xi1>, vector<32x32xf32>
    %36 = math.tanh %35 : vector<32x32xf32>
    %37 = arith.mulf %21, %36 : vector<32x32xf32>
    %38 = vector.extract_strided_slice %37 {offsets = [0, 0], sizes = [32, 16], strides = [1, 1]} : vector<32x32xf32> to vector<32x16xf32>
    %39 = vector.extract_strided_slice %37 {offsets = [0, 16], sizes = [32, 16], strides = [1, 1]} : vector<32x32xf32> to vector<32x16xf32>
    %c0_12 = arith.constant 0 : index
    %c0_13 = arith.constant 0 : index
    %40 = vector.load %arg3[%c0_12, %c0_13] : memref<32x96xf32, #tpu.memory_space<vmem>>, vector<32x96xf32>
    %c0_14 = arith.constant 0 : index
    %c0_15 = arith.constant 0 : index
    %41 = vector.load %arg4[%c0_14, %c0_15] : memref<32x1xf32, #tpu.memory_space<vmem>>, vector<32x1xf32>
    %cst_16 = arith.constant 0.000000e+00 : f32
    %42 = vector.broadcast %cst_16 : f32 to vector<32x1xf32>
    %43 = vector.extract_strided_slice %38 {offsets = [0, 0], sizes = [32, 15], strides = [1, 1]} : vector<32x16xf32> to vector<32x15xf32>
    %44 = tpu.concatenate %42, %43 in 1 : vector<32x1xf32>, vector<32x15xf32> -> vector<32x16xf32>
    %45 = vector.extract_strided_slice %38 {offsets = [0, 1], sizes = [32, 15], strides = [1, 1]} : vector<32x16xf32> to vector<32x15xf32>
    %46 = tpu.concatenate %45, %42 in 1 : vector<32x15xf32>, vector<32x1xf32> -> vector<32x16xf32>
    %47 = tpu.concatenate %44, %38, %46 in 0 : vector<32x16xf32>, vector<32x16xf32>, vector<32x16xf32> -> vector<96x16xf32>
    %cst_17 = arith.constant 0.000000e+00 : f32
    %48 = vector.broadcast %cst_17 : f32 to vector<32x1xf32>
    %49 = vector.extract_strided_slice %39 {offsets = [0, 0], sizes = [32, 15], strides = [1, 1]} : vector<32x16xf32> to vector<32x15xf32>
    %50 = tpu.concatenate %48, %49 in 1 : vector<32x1xf32>, vector<32x15xf32> -> vector<32x16xf32>
    %51 = vector.extract_strided_slice %39 {offsets = [0, 1], sizes = [32, 15], strides = [1, 1]} : vector<32x16xf32> to vector<32x15xf32>
    %52 = tpu.concatenate %51, %48 in 1 : vector<32x15xf32>, vector<32x1xf32> -> vector<32x16xf32>
    %53 = tpu.concatenate %50, %39, %52 in 0 : vector<32x16xf32>, vector<32x16xf32>, vector<32x16xf32> -> vector<96x16xf32>
    %54 = tpu.concatenate %47, %53 in 1 : vector<96x16xf32>, vector<96x16xf32> -> vector<96x32xf32>
    %cst_18 = arith.constant dense<0.000000e+00> : vector<32x32xf32>
    %55 = tpu.matmul %40, %54, %cst_18 {dimension_numbers = #tpu.dot_dimension_numbers<[1], [0], [0], [1], [0, 0, 1, 1], [], []>} : vector<32x96xf32>, vector<96x32xf32>, vector<32x32xf32> -> vector<32x32xf32>
    %56 = vector.broadcast %41 : vector<32x1xf32> to vector<32x32xf32>
    %57 = arith.addf %55, %56 : vector<32x32xf32>
    %cst_19 = arith.constant 0.000000e+00 : f32
    %58 = vector.broadcast %cst_19 : f32 to vector<32x32xf32>
    %59 = arith.maximumf %57, %58 : vector<32x32xf32>
    %60 = vector.broadcast %cst_19 : f32 to vector<32x32xf32>
    %61 = arith.subf %57, %60 : vector<32x32xf32>
    %62 = arith.cmpf one, %61, %61 : vector<32x32xf32>
    %63 = vector.broadcast %cst_19 : f32 to vector<32x32xf32>
    %64 = arith.addf %57, %63 : vector<32x32xf32>
    %65 = math.absf %61 : vector<32x32xf32>
    %cst_20 = arith.constant 0.000000e+00 : f32
    %66 = vector.broadcast %cst_20 : f32 to vector<32x32xf32>
    %67 = arith.subf %66, %65 : vector<32x32xf32>
    %68 = math.exp %67 : vector<32x32xf32>
    %69 = math.log1p %68 : vector<32x32xf32>
    %70 = arith.addf %59, %69 : vector<32x32xf32>
    %71 = arith.select %62, %64, %70 : vector<32x32xi1>, vector<32x32xf32>
    %72 = math.tanh %71 : vector<32x32xf32>
    %73 = arith.mulf %57, %72 : vector<32x32xf32>
    %74 = vector.extract_strided_slice %73 {offsets = [0, 0], sizes = [32, 16], strides = [1, 1]} : vector<32x32xf32> to vector<32x16xf32>
    %75 = vector.extract_strided_slice %73 {offsets = [0, 16], sizes = [32, 16], strides = [1, 1]} : vector<32x32xf32> to vector<32x16xf32>
    %c0_21 = arith.constant 0 : index
    %c0_22 = arith.constant 0 : index
    %c0_23 = arith.constant 0 : index
    %76 = vector.load %arg5[%c0_21, %c0_22, %c0_23] : memref<2x32x16xf32, #tpu.memory_space<vmem>>, vector<1x32x16xf32>
    %77 = vector.shape_cast %76 : vector<1x32x16xf32> to vector<32x16xf32>
    %78 = vector.shape_cast %74 : vector<32x16xf32> to vector<1x32x16xf32>
    tpu.vector_store %arg5[%c0_21, %c0_22, %c0_23], %78 {strides = array<i32>} : memref<2x32x16xf32, #tpu.memory_space<vmem>>, vector<1x32x16xf32>,
    %c1_24 = arith.constant 1 : index
    %c0_25 = arith.constant 0 : index
    %c0_26 = arith.constant 0 : index
    %79 = vector.load %arg5[%c1_24, %c0_25, %c0_26] : memref<2x32x16xf32, #tpu.memory_space<vmem>>, vector<1x32x16xf32>
    %80 = vector.shape_cast %79 : vector<1x32x16xf32> to vector<32x16xf32>
    %81 = vector.shape_cast %75 : vector<32x16xf32> to vector<1x32x16xf32>
    tpu.vector_store %arg5[%c1_24, %c0_25, %c0_26], %81 {strides = array<i32>} : memref<2x32x16xf32, #tpu.memory_space<vmem>>, vector<1x32x16xf32>,
    return
  }
}

</mosaic_0001>

<bundles_post_ra>
// kernel: pred_head_branch.1
= control target key start
LH: loop header
LB: loop body
LE: loop exit
PB: predicated region body
PF: predicated region fallthrough
CT: control target
= control target key end

     0   :  { %s897_s22 = smov 127   ;;  %s898_s27 = smov 1   ;;  %vm70_vm0 = vcmask 121856   ;;  %vm53_vm1 = vcmask 7168   ;;  %vm188_vm2 = vcmask 785408   ;;  %v900_v24 = vmov 0   ;;  %s1274_s0 = inlined_call_operand.vmem [shape: f32[2,32,16], index: 0, kind: input, shape index: {}]   ;;  %s1275_s1 = inlined_call_operand.vmem [shape: f32[32,96], index: 1, kind: input, shape index: {}]   ;;  %s1276_s2 = inlined_call_operand.vmem [shape: f32[32,1], index: 2, kind: input, shape index: {}]   ;;  %s1277_s3 = inlined_call_operand.vmem [shape: f32[32,96], index: 3, kind: input, shape index: {}]   ;;  %s1278_s4 = inlined_call_operand.vmem [shape: f32[32,1], index: 4, kind: input, shape index: {}]   ;;  %s1279_s5 = inlined_call_operand.vmem [shape: f32[2,32,16], index: 5, kind: output, shape index: {}]  }
   0x1   :  { %v735_v0 = vld [vmem:[%s1274_s0 + $0x38] sm:$0xff]  ;;  %v733_v1 = vld [vmem:[%s1274_s0 + $0x28] sm:$0xff]  ;;  %v734_v2 = vld [vmem:[%s1274_s0 + $0x30] sm:$0xff]  ;;  %s899_s30 = smov 16   ;;  %848 = vset.pattern.permute.xlu1 %v900_v24  ;;  %847 = vset.pattern.permute.xlu0 %v900_v24  ;;  %vm155_vm3 = vcmask 130048   ;;  %s902_s28 = smov 112  }
   0x2   :  { %101 = vrot.lane.b32.xlu0 %v735_v0, %s897_s22  ;;  %97 = vrot.lane.b32.xlu1 %v733_v1, %s897_s22  ;;  %v732_v3 = vld [vmem:[%s1274_s0 + $0x20] sm:$0xff]  ;;  %v957_v4 = vld [vmem:[%s1274_s0 + $0x18] sm:$0xff]  ;;  %s903_s29 = smov 113  }
   0x3   :  { %v965_v5 = vld [vmem:[%s1274_s0 + $0x10] sm:$0xff]  ;;  %v973_v6 = vld [vmem:[%s1274_s0 + $0x8] sm:$0xff]  ;;  %v980_v7 = vld [vmem:[%s1274_s0] sm:$0xff] }
   0x4   :  { %v29_v19 = vld [vmem:[%s1275_s1] sm:$0xff]  ;;  %v36_v25 = vld [vmem:[%s1276_s2 + $0x18] sm:$0xff]  ;;  %v35_v28 = vld [vmem:[%s1276_s2 + $0x10] sm:$0xff] }
   0x5   :  { %804 = vmatprep.mubr.msk.f32.mxu0 %vm188_vm2, %v29_v19  ;;  %v33_v27 = vld [vmem:[%s1276_s2] sm:$0xff]  ;;  %v34_v29 = vld [vmem:[%s1276_s2 + $0x8] sm:$0xff] }
   0x6   :  { %99 = vrot.lane.b32.xlu0 %v734_v2, %s897_s22  ;;  %95 = vrot.lane.b32.xlu1 %v732_v3, %s897_s22 }
   0xa   :  { %85 = vrot.lane.b32.xlu0 %v735_v0, %s898_s27  ;;  %83 = vrot.lane.b32.xlu1 %v734_v2, %s898_s27 }
   0xe   :  { %81 = vrot.lane.b32.xlu0 %v733_v1, %s898_s27  ;;  %79 = vrot.lane.b32.xlu1 %v732_v3, %s898_s27 }
  0x12   :  { %64 = vrot.lane.b32.xlu0 %v957_v4, %s897_s22  ;;  %131 = vrot.lane.b32.xlu1 %v734_v2, %s899_s30 }
  0x16   :  { %62 = vrot.lane.b32.xlu0 %v965_v5, %s897_s22  ;;  %127 = vrot.lane.b32.xlu1 %v732_v3, %s899_s30 }
  0x1a   :  { %60 = vrot.lane.b32.xlu0 %v973_v6, %s897_s22 }
  0x1e   :  { %58 = vrot.lane.b32.xlu0 %v980_v7, %s897_s22 }
  0x22   :  { %133 = vrot.lane.b32.xlu0 %v735_v0, %s899_s30 }
  0x26   :  { %129 = vrot.lane.b32.xlu0 %v733_v1, %s899_s30 }
  0x2a   :  { %47 = vrot.lane.b32.xlu0 %v957_v4, %s898_s27 }
  0x2e   :  { %45 = vrot.lane.b32.xlu0 %v965_v5, %s898_s27 }
  0x32   :  { %43 = vrot.lane.b32.xlu0 %v973_v6, %s898_s27 }
  0x36   :  { %41 = vrot.lane.b32.xlu0 %v980_v7, %s898_s27 }
  0x3a   :  { %185 = vperm.xlu0 %847, %v36_v25  }
  0x3e   :  { %170 = vperm.xlu0 %847, %v33_v27  }
  0x74   :  { %v102_v8 = vpop.permute.xlu0 %101  ;;  %v98_v10 = vpop.permute.xlu1 %97 }
  0x75   :  { %v110_v9 = vsel %vm70_vm0, %v102_v8, 0.0  ;;  %v108_v13 = vsel %vm70_vm0, %v98_v10, 0.0  ;;  %v32_v8 = vld [vmem:[%s1275_s1 + $0x18] sm:$0xff] }
  0x76   :  { %141 = vrot.lane.b32.xlu1 %v110_v9, %s899_s30 }
  0x78   :  { %v100_v11 = vpop.permute.xlu0 %99  ;;  %v96_v14 = vpop.permute.xlu1 %95 }
  0x79   :  { %v109_v12 = vsel %vm70_vm0, %v100_v11, 0.0  ;;  %v107_v15 = vsel %vm70_vm0, %v96_v14, 0.0 }
  0x7a   :  { %139 = vrot.lane.b32.xlu1 %v109_v12, %s899_s30 }
  0x7c   :  { %v86_v16 = vpop.permute.xlu0 %85  ;;  %v84_v18 = vpop.permute.xlu1 %83 }
  0x7d   :  { %v94_v17 = vsel %vm53_vm1, 0.0, %v86_v16  ;;  %v93_v20 = vsel %vm53_vm1, 0.0, %v84_v18 }
  0x7e   :  { %137 = vrot.lane.b32.xlu1 %v108_v13, %s899_s30 }
  0x80   :  { %v82_v21 = vpop.permute.xlu0 %81  ;;  %v80_v23 = vpop.permute.xlu1 %79 }
  0x81   :  { %v92_v22 = vsel %vm53_vm1, 0.0, %v82_v21  ;;  %v91_v26 = vsel %vm53_vm1, 0.0, %v80_v23 }
  0x82   :  { %135 = vrot.lane.b32.xlu1 %v107_v15, %s899_s30 }
  0x84   :  { %v65_v30 = vpop.permute.xlu0 %64  ;;  %v132_v34 = vpop.permute.xlu1 %131 }
  0x85   :  { %v74_v38 = vsel %vm70_vm0, %v65_v30, 0.0  ;;  %v162_v54 = vsel %vm155_vm3, %v965_v5, %v132_v34 }
  0x86   :  { %125 = vrot.lane.b32.xlu1 %v94_v17, %s899_s30 }
  0x88   :  { %v63_v31 = vpop.permute.xlu0 %62  ;;  %v128_v36 = vpop.permute.xlu1 %127 }
  0x89   :  { %v73_v41 = vsel %vm70_vm0, %v63_v31, 0.0  ;;  %v160_v59 = vsel %vm155_vm3, %v980_v7, %v128_v36  ;;  %v31_v7 = vld [vmem:[%s1275_s1 + $0x10] sm:$0xff] }
  0x8a   :  { %123 = vrot.lane.b32.xlu1 %v93_v20, %s899_s30 }
  0x8c   :  { %v61_v32 = vpop.permute.xlu0 %60 }
  0x8d   :  { %v72_v45 = vsel %vm70_vm0, %v61_v32, 0.0 }
  0x8e   :  { %121 = vrot.lane.b32.xlu1 %v92_v22, %s899_s30 }
  0x90   :  { %v59_v33 = vpop.permute.xlu0 %58 }
  0x91   :  { %v71_v49 = vsel %vm70_vm0, %v59_v33, 0.0 }
  0x92   :  { %119 = vrot.lane.b32.xlu1 %v91_v26, %s899_s30 }
  0x94   :  { %v134_v35 = vpop.permute.xlu0 %133 }
  0x95   :  { %v163_v52 = vsel %vm155_vm3, %v957_v4, %v134_v35 }
  0x96   :  { %180 = vperm.xlu1 %848, %v35_v28  }
  0x98   :  { %v130_v37 = vpop.permute.xlu0 %129 }
  0x99   :  { %v161_v56 = vsel %vm155_vm3, %v973_v6, %v130_v37  ;;  %v30_v6 = vld [vmem:[%s1275_s1 + $0x8] sm:$0xff]  ;;  %s901_s1 = smov 111  }
  0x9a   :  { %175 = vperm.xlu1 %848, %v34_v29  }
  0x9c   :  { %v48_v44 = vpop.permute.xlu0 %47 }
  0x9d   :  { %v57_v57 = vsel %vm53_vm1, 0.0, %v48_v44 }
  0xa0   :  { %v46_v48 = vpop.permute.xlu0 %45 }
  0xa1   :  { %v56_v60 = vsel %vm53_vm1, 0.0, %v46_v48 }
  0xa4   :  { %v44_v55 = vpop.permute.xlu0 %43 }
  0xa5   :  { %v55_v63 = vsel %vm53_vm1, 0.0, %v44_v55 }
  0xa8   :  { %v42_v62 = vpop.permute.xlu0 %41 }
  0xa9   :  { %v54_v2 = vsel %vm53_vm1, 0.0, %v42_v62 }
  0xb5   :  { %v186_v10 = vpop.permute.xlu0 %185 }
  0xb9   :  { %v171_v13 = vpop.permute.xlu0 %170 }
  0xe8   :  { %v142_v39 = vpop.permute.xlu1 %141 }
  0xe9   :  { %v167_v40 = vsel %vm155_vm3, %v74_v38, %v142_v39 }
  0xea   :  { %780 = vmatprep.subr.mxu0 %v167_v40 }
  0xeb   :  { %781 = vmatpush3.msra.mxu0 %v167_v40 }
  0xec   :  { %v140_v42 = vpop.permute.xlu1 %139 }
  0xed   :  { %v166_v43 = vsel %vm155_vm3, %v73_v41, %v140_v42 }
  0xee   :  { %782 = vmatprep.subr.mxu0 %v166_v43 }
  0xef   :  { %783 = vmatpush3.msra.mxu0 %v166_v43 }
  0xf0   :  { %v138_v46 = vpop.permute.xlu1 %137 }
  0xf1   :  { %v165_v47 = vsel %vm155_vm3, %v72_v45, %v138_v46 }
  0xf2   :  { %784 = vmatprep.subr.mxu0 %v165_v47 }
  0xf3   :  { %785 = vmatpush3.msra.mxu0 %v165_v47 }
  0xf4   :  { %v136_v50 = vpop.permute.xlu1 %135 }
  0xf5   :  { %v164_v51 = vsel %vm155_vm3, %v71_v49, %v136_v50 }
  0xf6   :  { %786 = vmatprep.subr.mxu0 %v164_v51 }
  0xf7   :  { %787 = vmatpush3.msra.mxu0 %v164_v51 }
  0xf8   :  { %v126_v53 = vpop.permute.xlu1 %125  ;;  %788 = vmatprep.subr.mxu0 %v163_v52 }
  0xf9   :  { %789 = vmatpush3.msra.mxu0 %v163_v52  ;;  %v159_v61 = vsel %vm155_vm3, %v57_v57, %v126_v53 }
  0xfa   :  { %790 = vmatprep.subr.mxu0 %v162_v54 }
  0xfb   :  { %791 = vmatpush3.msra.mxu0 %v162_v54 }
  0xfc   :  { %v124_v58 = vpop.permute.xlu1 %123  ;;  %792 = vmatprep.subr.mxu0 %v161_v56 }
  0xfd   :  { %793 = vmatpush3.msra.mxu0 %v161_v56  ;;  %v158_v1 = vsel %vm155_vm3, %v56_v60, %v124_v58 }
  0xfe   :  { %794 = vmatprep.subr.mxu0 %v160_v59 }
  0xff   :  { %795 = vmatpush3.msra.mxu0 %v160_v59 }
 0x100   :  { %v122_v0 = vpop.permute.xlu1 %121  ;;  %796 = vmatprep.subr.mxu0 %v159_v61 }
 0x101   :  { %797 = vmatpush3.msra.mxu0 %v159_v61  ;;  %v157_v3 = vsel %vm155_vm3, %v55_v63, %v122_v0 }
 0x102   :  { %798 = vmatprep.subr.mxu0 %v158_v1 }
 0x103   :  { %799 = vmatpush3.msra.mxu0 %v158_v1 }
 0x104   :  { %v120_v4 = vpop.permute.xlu1 %119  ;;  %800 = vmatprep.subr.mxu0 %v157_v3 }
 0x105   :  { %801 = vmatpush3.msra.mxu0 %v157_v3  ;;  %v156_v5 = vsel %vm155_vm3, %v54_v2, %v120_v4 }
 0x106   :  { %802 = vmatprep.subr.mxu0 %v156_v5 }
 0x107   :  { %803 = vmatpush3.msra.mxu0 %v156_v5 }
 0x108   :  { %805 = vmatmul.mubr.msk.f32.vlgmr.msra.gmra.mxu0 %vm188_vm2, %v30_v6 }
 0x109   :  { %807 = vmatprep.mubr.msk.f32.mxu0 %vm188_vm2, %v31_v7 }
 0x10c   :  { %808 = vmatmul.mubr.msk.f32.gmra.mxu0 %vm188_vm2, %v32_v8 }
 0x111   :  { %v181_v9 = vpop.permute.xlu1 %180 }
 0x115   :  { %v176_v11 = vpop.permute.xlu1 %175 }
 0x1c8   :  { %v806_v12 = vpop.f32.mrf.mxu0 }
 0x1c9   :  { %v1062_v14 = vadd.f32 %v806_v12, %v176_v11 }
 0x1ca   :  { %v267_v15 = vpop.f32.mrf.mxu0 }
 0x1cb   :  { %v299_v16 = vand.u32 2147483647, %v1062_v14  ;;  %v1065_v17 = vadd.f32 %v267_v15, %v171_v13  ;;  %v287_v57 = vmax.f32 %v1062_v14, 0.0  ;;  %vm291_vm7 = vcmp.ne.f32.partialorder %v1062_v14, %v1062_v14 }
 0x1cc   :  { %v809_v18 = vpop.f32.mrf.mxu0 }
 0x1cd   :  { %v303_v19 = vsub.f32 0.0, %v299_v16  ;;  %v298_v20 = vand.u32 2147483647, %v1065_v17  ;;  %v1068_v21 = vadd.f32 %v809_v18, %v186_v10  ;;  %v286_v3 = vmax.f32 %v1065_v17, 0.0 }
 0x1ce   :  { %v277_v22 = vpop.f32.mrf.mxu0  ;;  %vm290_vm10 = vcmp.ne.f32.partialorder %v1065_v17, %v1065_v17 }
 0x1cf   :  { %v308_v23 = vmul.f32 1.442695, %v303_v19  ;;  %v302_v24 = vsub.f32 0.0, %v298_v20  ;;  %v1070_v25 = vadd.f32 %v277_v22, %v181_v9  ;;  %v301_v26 = vand.u32 2147483647, %v1068_v21 }
 0x1d0   :  { %v289_v4 = vmax.f32 %v1068_v21, 0.0  ;;  %vm293_vm9 = vcmp.ne.f32.partialorder %v1068_v21, %v1068_v21 }
 0x1d1   :  { %849 = vpow2.f32 %v308_v23  ;;  %v306_v27 = vmul.f32 1.442695, %v302_v24  ;;  %v305_v28 = vsub.f32 0.0, %v301_v26  ;;  %v300_v29 = vand.u32 2147483647, %v1070_v25 }
 0x1d2   :  { %v288_v10 = vmax.f32 %v1070_v25, 0.0  ;;  %vm292_vm11 = vcmp.ne.f32.partialorder %v1070_v25, %v1070_v25 }
 0x1d3   :  { %851 = vpow2.f32 %v306_v27  ;;  %v312_v30 = vmul.f32 1.442695, %v305_v28  ;;  %v304_v31 = vsub.f32 0.0, %v300_v29 }
 0x1d5   :  { %853 = vpow2.f32 %v312_v30  ;;  %v310_v32 = vmul.f32 1.442695, %v304_v31 }
 0x1d7   :  { %855 = vpow2.f32 %v310_v32 }
 0x1de   :  { %v850_v33 = vpop.eup %849 }
 0x1df   :  { %v323_v34 = vadd.f32 1.0, %v850_v33  ;;  %v326_v41 = vmul.f32 -0.5, %v850_v33  ;;  %v329_v44 = vand.u32 2147483647, %v850_v33 }
 0x1e0   :  { %v852_v35 = vpop.eup %851 }
 0x1e1   :  { %857 = vlog2.f32 %v323_v34  ;;  %v314_v36 = vadd.f32 1.0, %v852_v35  ;;  %v317_v42 = vmul.f32 -0.5, %v852_v35  ;;  %v327_v43 = vadd.f32 1.0, %v326_v41 }
 0x1e2   :  { %v854_v37 = vpop.eup %853  ;;  %v320_v51 = vand.u32 2147483647, %v852_v35  ;;  %vm330_vm4 = vcmp.lt.f32.partialorder %v329_v44, 0.0004427343 }
 0x1e3   :  { %859 = vlog2.f32 %v314_v36  ;;  %v341_v38 = vadd.f32 1.0, %v854_v37  ;;  %v344_v45 = vmul.f32 -0.5, %v854_v37  ;;  %v318_v47 = vadd.f32 1.0, %v317_v42 }
 0x1e4   :  { %v856_v39 = vpop.eup %855  ;;  %v328_v50 = vmul.f32 %v850_v33, %v327_v43  ;;  %v347_v56 = vand.u32 2147483647, %v854_v37  ;;  %vm321_vm5 = vcmp.lt.f32.partialorder %v320_v51, 0.0004427343  ;;  %v370_v43 = vld [vmem:[%s1278_s4] sm:$0xff] }
 0x1e5   :  { %861 = vlog2.f32 %v341_v38  ;;  %v332_v40 = vadd.f32 1.0, %v856_v39  ;;  %v335_v48 = vmul.f32 -0.5, %v856_v39  ;;  %v345_v53 = vadd.f32 1.0, %v344_v45 }
 0x1e6   :  { %v319_v58 = vmul.f32 %v852_v35, %v318_v47  ;;  %v338_v61 = vand.u32 2147483647, %v856_v39  ;;  %vm348_vm6 = vcmp.lt.f32.partialorder %v347_v56, 0.0004427343 }
 0x1e7   :  { %863 = vlog2.f32 %v332_v40  ;;  %v336_v59 = vadd.f32 1.0, %v335_v48  ;;  %v346_v1 = vmul.f32 %v854_v37, %v345_v53  ;;  %v366_v40 = vld [vmem:[%s1277_s3] sm:$0xff]  ;;  %v371_v48 = vld [vmem:[%s1278_s4 + $0x8] sm:$0xff] }
 0x1e8   :  { %vm339_vm8 = vcmp.lt.f32.partialorder %v338_v61, 0.0004427343  ;;  %834 = vmatprep.mubr.msk.f32.mxu1 %vm188_vm2, %v366_v40 }
 0x1e9   :  { %v337_v7 = vmul.f32 %v856_v39, %v336_v59 }
 0x1ee   :  { %v858_v46 = vpop.eup %857 }
 0x1ef   :  { %v325_v49 = vmul.f32 0.6931472, %v858_v46  ;;  %v372_v46 = vld [vmem:[%s1278_s4 + $0x10] sm:$0xff] }
 0x1f0   :  { %v860_v52 = vpop.eup %859 }
 0x1f1   :  { %v331_v54 = vsel %vm330_vm4, %v328_v50, %v325_v49  ;;  %v316_v55 = vmul.f32 0.6931472, %v860_v52  ;;  %v373_v49 = vld [vmem:[%s1278_s4 + $0x18] sm:$0xff] }
 0x1f2   :  { %v862_v60 = vpop.eup %861  ;;  %v351_v62 = vadd.f32 %v331_v54, %v287_v57 }
 0x1f3   :  { %v322_v63 = vsel %vm321_vm5, %v319_v58, %v316_v55  ;;  %v343_v0 = vmul.f32 0.6931472, %v862_v60 }
 0x1f4   :  { %v864_v2 = vpop.eup %863  ;;  %v350_v8 = vadd.f32 %v322_v63, %v286_v3  ;;  %v355_v11 = vsel %vm291_vm7, %v1062_v14, %v351_v62 }
 0x1f5   :  { %v349_v5 = vsel %vm348_vm6, %v346_v1, %v343_v0  ;;  %v334_v6 = vmul.f32 0.6931472, %v864_v2 }
 0x1f6   :  { %v353_v9 = vadd.f32 %v349_v5, %v289_v4  ;;  %v354_v16 = vsel %vm290_vm10, %v1065_v17, %v350_v8 }
 0x1f7   :  { %v340_v12 = vsel %vm339_vm8, %v337_v7, %v334_v6 }
 0x1f8   :  { %v357_v13 = vsel %vm293_vm9, %v1068_v21, %v353_v9  ;;  %v352_v15 = vadd.f32 %v340_v12, %v288_v10 }
 0x1f9   :  { %865 = vtanh.f32 %v357_v13 }
 0x1fa   :  { %867 = vtanh.f32 %v355_v11  ;;  %v356_v18 = vsel %vm292_vm11, %v1070_v25, %v352_v15 }
 0x1fb   :  { %869 = vtanh.f32 %v356_v18 }
 0x1fc   :  { %871 = vtanh.f32 %v354_v16 }
 0x206   :  { %v866_v19 = vpop.eup %865 }
 0x207   :  { %v868_v20 = vpop.eup %867  ;;  %v1091_v22 = vmul.f32 %v866_v19, %v1068_v21 }
 0x208   :  { %v870_v23 = vpop.eup %869  ;;  %v1098_v27 = vmul.f32 %v868_v20, %v1062_v14 }
 0x209   :  { %v1094_v24 = vmul.f32 %v870_v23, %v1070_v25  ;;  %432 = vrot.lane.b32.xlu1 %v1091_v22, %s901_s1  ;;  %v872_v26 = vpop.eup %871 }
 0x20a   :  { %v1102_v28 = vmul.f32 %v872_v26, %v1065_v17 }
 0x20b   :  { %430 = vrot.lane.b32.xlu0 %v1094_v24, %s901_s1 }
 0x20d   :  { %428 = vrot.lane.b32.xlu1 %v1098_v27, %s901_s1 }
 0x20f   :  { %426 = vrot.lane.b32.xlu0 %v1102_v28, %s901_s1 }
 0x211   :  { %448 = vrot.lane.b32.xlu1 %v1091_v22, %s902_s28 }
 0x213   :  { %446 = vrot.lane.b32.xlu0 %v1094_v24, %s902_s28 }
 0x215   :  { %444 = vrot.lane.b32.xlu1 %v1098_v27, %s902_s28 }
 0x217   :  { %442 = vrot.lane.b32.xlu0 %v1102_v28, %s902_s28 }
 0x219   :  { %416 = vrot.lane.b32.xlu1 %v1091_v22, %s903_s29 }
 0x21b   :  { %414 = vrot.lane.b32.xlu0 %v1094_v24, %s903_s29 }
 0x21d   :  { %412 = vrot.lane.b32.xlu1 %v1098_v27, %s903_s29 }
 0x21f   :  { %410 = vrot.lane.b32.xlu0 %v1102_v28, %s903_s29 }
 0x221   :  { %400 = vrot.lane.b32.xlu1 %v1091_v22, %s897_s22 }
 0x225   :  { %396 = vrot.lane.b32.xlu1 %v1098_v27, %s897_s22 }
 0x229   :  { %394 = vrot.lane.b32.xlu1 %v1102_v28, %s897_s22 }
 0x22d   :  { %398 = vrot.lane.b32.xlu1 %v1094_v24, %s897_s22 }
 0x27b   :  { %v433_v14 = vpop.permute.xlu1 %432 }
 0x27c   :  { %v441_v33 = vsel %vm70_vm0, %v433_v14, 0.0 }
 0x27d   :  { %v431_v17 = vpop.permute.xlu0 %430 }
 0x27e   :  { %v440_v35 = vsel %vm70_vm0, %v431_v17, 0.0  ;;  %v367_v17 = vld [vmem:[%s1277_s3 + $0x8] sm:$0xff] }
 0x27f   :  { %v429_v21 = vpop.permute.xlu1 %428 }
 0x280   :  { %v439_v25 = vsel %vm70_vm0, %v429_v21, 0.0  ;;  %v368_v21 = vld [vmem:[%s1277_s3 + $0x10] sm:$0xff] }
 0x281   :  { %476 = vrot.lane.b32.xlu0 %v439_v25, %s899_s30  ;;  %v427_v29 = vpop.permute.xlu0 %426  ;;  %v369_v25 = vld [vmem:[%s1277_s3 + $0x18] sm:$0xff] }
 0x282   :  { %v438_v31 = vsel %vm70_vm0, %v427_v29, 0.0 }
 0x283   :  { %v449_v30 = vpop.permute.xlu1 %448 }
 0x285   :  { %474 = vrot.lane.b32.xlu0 %v438_v31, %s899_s30  ;;  %v447_v34 = vpop.permute.xlu0 %446 }
 0x287   :  { %v445_v32 = vpop.permute.xlu1 %444 }
 0x288   :  { %468 = vrot.lane.b32.xlu1 %v445_v32, %s899_s30 }
 0x289   :  { %480 = vrot.lane.b32.xlu0 %v441_v33, %s899_s30  ;;  %v443_v37 = vpop.permute.xlu0 %442 }
 0x28b   :  { %v417_v36 = vpop.permute.xlu1 %416 }
 0x28c   :  { %472 = vrot.lane.b32.xlu1 %v449_v30, %s899_s30  ;;  %v425_v38 = vsel %vm53_vm1, 0.0, %v417_v36 }
 0x28d   :  { %470 = vrot.lane.b32.xlu0 %v447_v34, %s899_s30  ;;  %v415_v41 = vpop.permute.xlu0 %414 }
 0x28e   :  { %v424_v44 = vsel %vm53_vm1, 0.0, %v415_v41 }
 0x28f   :  { %v413_v39 = vpop.permute.xlu1 %412 }
 0x290   :  { %384 = vrot.lane.b32.xlu1 %v1091_v22, %s898_s27  ;;  %v423_v42 = vsel %vm53_vm1, 0.0, %v413_v39 }
 0x291   :  { %478 = vrot.lane.b32.xlu0 %v440_v35, %s899_s30  ;;  %v411_v45 = vpop.permute.xlu0 %410 }
 0x292   :  { %v422_v47 = vsel %vm53_vm1, 0.0, %v411_v45 }
 0x293   :  { %v401_v50 = vpop.permute.xlu1 %400 }
 0x294   :  { %382 = vrot.lane.b32.xlu1 %v1094_v24, %s898_s27  ;;  %v409_v57 = vsel %vm70_vm0, %v401_v50, 0.0 }
 0x295   :  { %466 = vrot.lane.b32.xlu0 %v443_v37, %s899_s30 }
 0x297   :  { %v397_v51 = vpop.permute.xlu1 %396 }
 0x298   :  { %380 = vrot.lane.b32.xlu1 %v1098_v27, %s898_s27  ;;  %v407_v2 = vsel %vm70_vm0, %v397_v51, 0.0 }
 0x299   :  { %464 = vrot.lane.b32.xlu0 %v425_v38, %s899_s30 }
 0x29b   :  { %v395_v52 = vpop.permute.xlu1 %394 }
 0x29c   :  { %378 = vrot.lane.b32.xlu1 %v1102_v28, %s898_s27  ;;  %v406_v4 = vsel %vm70_vm0, %v395_v52, 0.0 }
 0x29d   :  { %460 = vrot.lane.b32.xlu0 %v423_v42, %s899_s30 }
 0x29f   :  { %v399_v54 = vpop.permute.xlu1 %398 }
 0x2a0   :  { %508 = vperm.xlu1 %848, %v370_v43   ;;  %v408_v63 = vsel %vm70_vm0, %v399_v54, 0.0 }
 0x2a1   :  { %462 = vrot.lane.b32.xlu0 %v424_v44, %s899_s30 }
 0x2a4   :  { %518 = vperm.xlu1 %848, %v372_v46  }
 0x2a5   :  { %458 = vrot.lane.b32.xlu0 %v422_v47, %s899_s30 }
 0x2a9   :  { %513 = vperm.xlu0 %847, %v371_v48  }
 0x2ad   :  { %523 = vperm.xlu0 %847, %v373_v49  }
 0x2f3   :  { %v477_v53 = vpop.permute.xlu0 %476 }
 0x2f4   :  { %v503_v3 = vsel %vm155_vm3, %v407_v2, %v477_v53 }
 0x2f7   :  { %v475_v55 = vpop.permute.xlu0 %474 }
 0x2f8   :  { %v502_v7 = vsel %vm155_vm3, %v406_v4, %v475_v55 }
 0x2fa   :  { %v469_v56 = vpop.permute.xlu1 %468 }
 0x2fb   :  { %v481_v58 = vpop.permute.xlu0 %480  ;;  %v499_v12 = vsel %vm155_vm3, %v1098_v27, %v469_v56 }
 0x2fc   :  { %v505_v59 = vsel %vm155_vm3, %v409_v57, %v481_v58 }
 0x2fd   :  { %810 = vmatprep.subr.mxu1 %v505_v59 }
 0x2fe   :  { %v473_v60 = vpop.permute.xlu1 %472  ;;  %811 = vmatpush3.msra.mxu1 %v505_v59 }
 0x2ff   :  { %v471_v61 = vpop.permute.xlu0 %470  ;;  %v501_v8 = vsel %vm155_vm3, %v1091_v22, %v473_v60 }
 0x300   :  { %v500_v10 = vsel %vm155_vm3, %v1094_v24, %v471_v61 }
 0x302   :  { %v385_v62 = vpop.permute.xlu1 %384 }
 0x303   :  { %v479_v0 = vpop.permute.xlu0 %478  ;;  %v393_v16 = vsel %vm53_vm1, 0.0, %v385_v62 }
 0x304   :  { %v504_v1 = vsel %vm155_vm3, %v408_v63, %v479_v0 }
 0x305   :  { %812 = vmatprep.subr.mxu1 %v504_v1 }
 0x306   :  { %813 = vmatpush3.msra.mxu1 %v504_v1  ;;  %v383_v6 = vpop.permute.xlu1 %382 }
 0x307   :  { %814 = vmatprep.subr.mxu1 %v503_v3  ;;  %v467_v5 = vpop.permute.xlu0 %466  ;;  %v392_v19 = vsel %vm53_vm1, 0.0, %v383_v6 }
 0x308   :  { %815 = vmatpush3.msra.mxu1 %v503_v3  ;;  %v498_v15 = vsel %vm155_vm3, %v1102_v28, %v467_v5 }
 0x309   :  { %816 = vmatprep.subr.mxu1 %v502_v7 }
 0x30a   :  { %817 = vmatpush3.msra.mxu1 %v502_v7  ;;  %v381_v11 = vpop.permute.xlu1 %380 }
 0x30b   :  { %818 = vmatprep.subr.mxu1 %v501_v8  ;;  %v465_v9 = vpop.permute.xlu0 %464  ;;  %v391_v24 = vsel %vm53_vm1, 0.0, %v381_v11 }
 0x30c   :  { %819 = vmatpush3.msra.mxu1 %v501_v8  ;;  %v497_v18 = vsel %vm155_vm3, %v393_v16, %v465_v9 }
 0x30d   :  { %820 = vmatprep.subr.mxu1 %v500_v10 }
 0x30e   :  { %821 = vmatpush3.msra.mxu1 %v500_v10  ;;  %v379_v22 = vpop.permute.xlu1 %378 }
 0x30f   :  { %822 = vmatprep.subr.mxu1 %v499_v12  ;;  %v461_v13 = vpop.permute.xlu0 %460  ;;  %v390_v27 = vsel %vm53_vm1, 0.0, %v379_v22 }
 0x310   :  { %823 = vmatpush3.msra.mxu1 %v499_v12  ;;  %v495_v26 = vsel %vm155_vm3, %v391_v24, %v461_v13 }
 0x311   :  { %824 = vmatprep.subr.mxu1 %v498_v15 }
 0x312   :  { %825 = vmatpush3.msra.mxu1 %v498_v15 }
 0x313   :  { %826 = vmatprep.subr.mxu1 %v497_v18  ;;  %v463_v20 = vpop.permute.xlu0 %462 }
 0x314   :  { %827 = vmatpush3.msra.mxu1 %v497_v18  ;;  %v496_v23 = vsel %vm155_vm3, %v392_v19, %v463_v20 }
 0x315   :  { %828 = vmatprep.subr.mxu1 %v496_v23 }
 0x316   :  { %829 = vmatpush3.msra.mxu1 %v496_v23 }
 0x317   :  { %830 = vmatprep.subr.mxu1 %v495_v26  ;;  %v459_v28 = vpop.permute.xlu0 %458 }
 0x318   :  { %831 = vmatpush3.msra.mxu1 %v495_v26  ;;  %v494_v14 = vsel %vm155_vm3, %v390_v27, %v459_v28 }
 0x319   :  { %832 = vmatprep.subr.mxu1 %v494_v14 }
 0x31a   :  { %833 = vmatpush3.msra.mxu1 %v494_v14 }
 0x31b   :  { %835 = vmatmul.mubr.msk.f32.vlgmr.msra.gmra.mxu1 %vm188_vm2, %v367_v17  ;;  %v509_v30 = vpop.permute.xlu1 %508 }
 0x31c   :  { %837 = vmatprep.mubr.msk.f32.mxu1 %vm188_vm2, %v368_v21 }
 0x31f   :  { %838 = vmatmul.mubr.msk.f32.gmra.mxu1 %vm188_vm2, %v369_v25  ;;  %v519_v40 = vpop.permute.xlu1 %518 }
 0x324   :  { %v514_v29 = vpop.permute.xlu0 %513 }
 0x328   :  { %v524_v37 = vpop.permute.xlu0 %523 }
 0x3db   :  { %v836_v31 = vpop.f32.mrf.mxu1 }
 0x3dc   :  { %v1206_v32 = vadd.f32 %v836_v31, %v514_v29 }
 0x3dd   :  { %v604_v33 = vpop.f32.mrf.mxu1 }
 0x3de   :  { %v636_v34 = vand.u32 2147483647, %v1206_v32  ;;  %v1209_v35 = vadd.f32 %v604_v33, %v509_v30  ;;  %v624_v9 = vmax.f32 %v1206_v32, 0.0  ;;  %vm628_vm14 = vcmp.ne.f32.partialorder %v1206_v32, %v1206_v32 }
 0x3df   :  { %v839_v36 = vpop.f32.mrf.mxu1 }
 0x3e0   :  { %v640_v38 = vsub.f32 0.0, %v636_v34  ;;  %v635_v39 = vand.u32 2147483647, %v1209_v35  ;;  %v1212_v41 = vadd.f32 %v839_v36, %v524_v37  ;;  %v623_v18 = vmax.f32 %v1209_v35, 0.0 }
 0x3e1   :  { %v614_v42 = vpop.f32.mrf.mxu1  ;;  %vm627_vm15 = vcmp.ne.f32.partialorder %v1209_v35, %v1209_v35 }
 0x3e2   :  { %v645_v43 = vmul.f32 1.442695, %v640_v38  ;;  %v639_v44 = vsub.f32 0.0, %v635_v39  ;;  %v1214_v45 = vadd.f32 %v614_v42, %v519_v40  ;;  %v638_v46 = vand.u32 2147483647, %v1212_v41 }
 0x3e3   :  { %v626_v17 = vmax.f32 %v1212_v41, 0.0  ;;  %vm630_vm2 = vcmp.ne.f32.partialorder %v1212_v41, %v1212_v41 }
 0x3e4   :  { %873 = vpow2.f32 %v645_v43  ;;  %v643_v47 = vmul.f32 1.442695, %v639_v44  ;;  %v642_v48 = vsub.f32 0.0, %v638_v46  ;;  %v637_v49 = vand.u32 2147483647, %v1214_v45 }
 0x3e5   :  { %v625_v33 = vmax.f32 %v1214_v45, 0.0  ;;  %vm629_vm4 = vcmp.ne.f32.partialorder %v1214_v45, %v1214_v45 }
 0x3e6   :  { %875 = vpow2.f32 %v643_v47  ;;  %v649_v50 = vmul.f32 1.442695, %v642_v48  ;;  %v641_v51 = vsub.f32 0.0, %v637_v49 }
 0x3e8   :  { %877 = vpow2.f32 %v649_v50  ;;  %v647_v52 = vmul.f32 1.442695, %v641_v51 }
 0x3ea   :  { %879 = vpow2.f32 %v647_v52 }
 0x3f1   :  { %v874_v53 = vpop.eup %873 }
 0x3f2   :  { %v660_v54 = vadd.f32 1.0, %v874_v53  ;;  %v663_v61 = vmul.f32 -0.5, %v874_v53  ;;  %v666_v0 = vand.u32 2147483647, %v874_v53 }
 0x3f3   :  { %v876_v55 = vpop.eup %875 }
 0x3f4   :  { %881 = vlog2.f32 %v660_v54  ;;  %v651_v56 = vadd.f32 1.0, %v876_v55  ;;  %v654_v62 = vmul.f32 -0.5, %v876_v55  ;;  %v664_v63 = vadd.f32 1.0, %v663_v61 }
 0x3f5   :  { %v878_v57 = vpop.eup %877  ;;  %v657_v4 = vand.u32 2147483647, %v876_v55  ;;  %vm667_vm12 = vcmp.lt.f32.partialorder %v666_v0, 0.0004427343 }
 0x3f6   :  { %883 = vlog2.f32 %v651_v56  ;;  %v678_v58 = vadd.f32 1.0, %v878_v57  ;;  %v681_v1 = vmul.f32 -0.5, %v878_v57  ;;  %v655_v2 = vadd.f32 1.0, %v654_v62 }
 0x3f7   :  { %v880_v59 = vpop.eup %879  ;;  %v665_v7 = vmul.f32 %v874_v53, %v664_v63  ;;  %v684_v15 = vand.u32 2147483647, %v878_v57  ;;  %vm658_vm13 = vcmp.lt.f32.partialorder %v657_v4, 0.0004427343 }
 0x3f8   :  { %885 = vlog2.f32 %v678_v58  ;;  %v669_v60 = vadd.f32 1.0, %v880_v59  ;;  %v672_v5 = vmul.f32 -0.5, %v880_v59  ;;  %v682_v10 = vadd.f32 1.0, %v681_v1 }
 0x3f9   :  { %v656_v13 = vmul.f32 %v876_v55, %v655_v2  ;;  %v675_v23 = vand.u32 2147483647, %v880_v59  ;;  %vm685_vm0 = vcmp.lt.f32.partialorder %v684_v15, 0.0004427343 }
 0x3fa   :  { %887 = vlog2.f32 %v669_v60  ;;  %v673_v19 = vadd.f32 1.0, %v672_v5  ;;  %v683_v28 = vmul.f32 %v878_v57, %v682_v10 }
 0x3fb   :  { %vm676_vm1 = vcmp.lt.f32.partialorder %v675_v23, 0.0004427343 }
 0x3fc   :  { %v674_v30 = vmul.f32 %v880_v59, %v673_v19 }
 0x401   :  { %v882_v3 = vpop.eup %881 }
 0x402   :  { %v662_v6 = vmul.f32 0.6931472, %v882_v3 }
 0x403   :  { %v884_v8 = vpop.eup %883 }
 0x404   :  { %v668_v11 = vsel %vm667_vm12, %v665_v7, %v662_v6  ;;  %v653_v12 = vmul.f32 0.6931472, %v884_v8 }
 0x405   :  { %v688_v16 = vadd.f32 %v668_v11, %v624_v9  ;;  %v886_v20 = vpop.eup %885 }
 0x406   :  { %v659_v22 = vsel %vm658_vm13, %v656_v13, %v653_v12  ;;  %v680_v27 = vmul.f32 0.6931472, %v886_v20 }
 0x407   :  { %v692_v24 = vsel %vm628_vm14, %v1206_v32, %v688_v16  ;;  %v687_v26 = vadd.f32 %v659_v22, %v623_v18  ;;  %v888_v14 = vpop.eup %887 }
 0x408   :  { %889 = vtanh.f32 %v692_v24  ;;  %v686_v25 = vsel %vm685_vm0, %v683_v28, %v680_v27  ;;  %v671_v29 = vmul.f32 0.6931472, %v888_v14 }
 0x409   :  { %v691_v21 = vsel %vm627_vm15, %v1209_v35, %v687_v26  ;;  %v690_v31 = vadd.f32 %v686_v25, %v626_v17 }
 0x40a   :  { %891 = vtanh.f32 %v691_v21  ;;  %v677_v34 = vsel %vm676_vm1, %v674_v30, %v671_v29 }
 0x40b   :  { %v694_v36 = vsel %vm630_vm2, %v1212_v41, %v690_v31  ;;  %v689_v37 = vadd.f32 %v677_v34, %v625_v33 }
 0x40c   :  { %893 = vtanh.f32 %v694_v36 }
 0x40d   :  { %v693_v38 = vsel %vm629_vm4, %v1214_v45, %v689_v37 }
 0x40e   :  { %895 = vtanh.f32 %v693_v38 }
 0x415   :  { %v890_v39 = vpop.eup %889 }
 0x416   :  { %v700_v40 = vmul.f32 %v890_v39, %v1206_v32 }
 0x417   :  { %v892_v42 = vpop.eup %891 }
 0x418   :  { %713 = vrot.lane.b32.xlu0 %v700_v40, %s902_s28  ;;  %704 = vst.msk [vmem:[%s1279_s5 + $0x8] sm:$0xff] %vm155_vm3, %v700_v40  ;;  %v699_v43 = vmul.f32 %v892_v42, %v1209_v35 }
 0x419   :  { %v894_v44 = vpop.eup %893 }
 0x41a   :  { %711 = vrot.lane.b32.xlu1 %v699_v43, %s902_s28  ;;  %703 = vst.msk [vmem:[%s1279_s5] sm:$0xff] %vm155_vm3, %v699_v43  ;;  %v702_v32 = vmul.f32 %v894_v44, %v1212_v41 }
 0x41b   :  { %v896_v46 = vpop.eup %895 }
 0x41c   :  { %717 = vrot.lane.b32.xlu0 %v702_v32, %s902_s28  ;;  %706 = vst.msk [vmem:[%s1279_s5 + $0x18] sm:$0xff] %vm155_vm3, %v702_v32  ;;  %v701_v35 = vmul.f32 %v896_v46, %v1214_v45 }
 0x41e   :  { %705 = vst.msk [vmem:[%s1279_s5 + $0x10] sm:$0xff] %vm155_vm3, %v701_v35  ;;  %715 = vrot.lane.b32.xlu1 %v701_v35, %s902_s28 }
 0x48a   :  { %v714_v47 = vpop.permute.xlu0 %713 }
 0x48b   :  { %745 = vst.msk [vmem:[%s1279_s5 + $0x28] sm:$0xff] %vm155_vm3, %v714_v47 }
 0x48c   :  { %v712_v41 = vpop.permute.xlu1 %711 }
 0x48d   :  { %744 = vst.msk [vmem:[%s1279_s5 + $0x20] sm:$0xff] %vm155_vm3, %v712_v41 }
 0x48e   :  { %v718_v45 = vpop.permute.xlu0 %717 }
 0x48f   :  { %747 = vst.msk [vmem:[%s1279_s5 + $0x38] sm:$0xff] %vm155_vm3, %v718_v45 }
 0x490   :  { %v716_v48 = vpop.permute.xlu1 %715 }
 0x491   :  { %746 = vst.msk [vmem:[%s1279_s5 + $0x30] sm:$0xff] %vm155_vm3, %v716_v48 }

</bundles_post_ra>
